<compile_context>
chip_gen: v7x
topology: tpu7x:2x2x1
jax: 0.10.0
libtpu: 0.0.40
codegen_flags: <defaults>
</compile_context>

<pallas_src>
import functools

import jax
import jax.numpy as jnp
from jax import lax
from jax.experimental import pallas as pl
from jax.experimental.pallas import tpu as pltpu


# Set to jnp.bfloat16 for ~2-3x MXU throughput on v6e/v7x (accumulation stays f32
# via preferred_element_type); default f32 keeps reference numerics.
MXU_INPUT_DTYPE = jnp.float32


def _mx(x):
    return x.astype(MXU_INPUT_DTYPE)


# ---------------------------------------------------------------------------
# helpers
# ---------------------------------------------------------------------------

def _row_tile(m, target=1024):
    """Largest tile <= target that divides m (multiple of 8), else m itself."""
    if m <= target:
        return m
    for t in range(target, 7, -8):
        if m % t == 0:
            return t
    return m


def _split_heads(x_flat, b, s, num_head, d_k):
    # (B*S, D) -> (B, H, S, Dk)   (query layout)
    return x_flat.reshape(b, s, num_head, d_k).transpose(0, 2, 1, 3)


def _split_heads_t(x_flat, b, s, num_head, d_k):
    # (B*S, D) -> (B, H, Dk, S)   lane axis = S: dense K/V blocks, contiguous DMA
    return x_flat.reshape(b, s, num_head, d_k).transpose(0, 2, 3, 1)


# ---------------------------------------------------------------------------
# Row-tiled dense projection kernel
# ---------------------------------------------------------------------------

def _linear_kernel(x_ref, w_ref, b_ref, o_ref):
    o_ref[...] = (
        jnp.dot(_mx(x_ref[...]), _mx(w_ref[...]),
                preferred_element_type=jnp.float32)
        + b_ref[...]
    ).astype(o_ref.dtype)


def linear_pallas(x, w, b, *, tile_m=1024):
    """y = x @ w + b, tiled over rows of x (double-buffered, megacore parallel)."""
    m, din = x.shape
    dout = w.shape[1]
    tm = _row_tile(m, tile_m)
    return pl.pallas_call(
        _linear_kernel,
        out_shape=jax.ShapeDtypeStruct((m, dout), jnp.float32),
        grid=(m // tm,),
        in_specs=[
            pl.BlockSpec((tm, din), lambda i: (i, 0)),
            pl.BlockSpec((din, dout), lambda i: (0, 0)),
            pl.BlockSpec((1, dout), lambda i: (0, 0)),
        ],
        out_specs=pl.BlockSpec((tm, dout), lambda i: (i, 0)),
        compiler_params=pltpu.CompilerParams(
            dimension_semantics=("parallel",)),
    )(x, w, b.reshape(1, dout))


# ---------------------------------------------------------------------------
# Fused attention + output-proj + residual + LayerNorm kernel
# ---------------------------------------------------------------------------

def _attn_layer_kernel(ng_ref, q_ref, k_ref, v_ref, wo_ref, bo_ref,
                       resid_ref, lnw_ref, lnb_ref,
                       out_ref, *score_refs,
                       num_head, d_k, seq_len, q_rows,
                       peek_cur, maxout, need_scores):
    neg = jnp.float32(-1e32)
    inv_sqrt_dk = jnp.float32(1.0 / (d_k ** 0.5))

    q = q_ref[0]            # (H, Tq, dk)  or (H, 1, dk) for block4
    kT = k_ref[0]           # (H, dk, S)   lane-dense
    vT = v_ref[0]           # (H, dk, S)   lane-dense

    # causal mask / |i-j| generated in-kernel (no constant DMA streams)
    row0 = pl.program_id(1) * q_rows
    rows = row0 + lax.broadcasted_iota(jnp.int32, (q_rows, seq_len), 0)
    cols = lax.broadcasted_iota(jnp.int32, (q_rows, seq_len), 1)
    allowed = (cols <= rows) if peek_cur else (cols < rows)        # (Tq, S)
    posf = jnp.abs(rows - cols).astype(jnp.float32)                # (Tq, S)

    # QK^T for all heads in a single batched MXU dispatch.  block4 path: q is a
    # single prototype row -> (H,1,S); broadcasting to (Tq,S) happens only at the
    # cheap VPU stages below, never on the MXU.
    s = jnp.einsum('htd,hds->hts', _mx(q), _mx(kT),
                   preferred_element_type=jnp.float32) * inv_sqrt_dk

    # --- temporal-decay ("position effect") term on a first masked softmax ---
    sm = jnp.where(allowed, s, neg)                                # (H, Tq, S)
    m1 = jnp.max(sm, axis=-1, keepdims=True)
    e1 = jnp.exp(sm - m1)
    p1 = e1 * pl.reciprocal(jnp.sum(e1, axis=-1, keepdims=True), approx=True)

    # reverse cumulative sum: rowsum - inclusive cumsum, built from log2(S)
    # static lane-shift adds (replaces the former (Tq,S)@(S,S) MXU matmul).
    csum = p1
    shift = 1
    while shift < seq_len:
        z = jnp.zeros(csum.shape[:-1] + (shift,), csum.dtype)
        csum = csum + jnp.concatenate(
            [z, csum[..., :seq_len - shift]], axis=-1)
        shift *= 2
    rev = jnp.sum(p1, axis=-1, keepdims=True) - csum               # sum_{t>j} p1
    dist = jnp.sqrt(jnp.maximum(rev * posf, 0.0))
    total_effect = jnp.clip(jnp.exp(dist * ng_ref[...]), 1e-5, 1e5)
    s = s * total_effect

    # --- final masked softmax + hard-zero of masked entries ---
    s = jnp.where(allowed, s, neg)
    m2 = jnp.max(s, axis=-1, keepdims=True)
    e2 = jnp.exp(s - m2)
    p2 = e2 * pl.reciprocal(jnp.sum(e2, axis=-1, keepdims=True), approx=True)
    p2 = jnp.where(allowed, p2, 0.0)

    if maxout:
        mx = jnp.max(p2, axis=-1, keepdims=True)
        # torch: scale = clamp(1/max, max=5); scores *= scale  (1/0 -> inf -> 5)
        p2 = p2 * jnp.minimum(1.0 / mx, 5.0)

    if need_scores:
        score_refs[0][0] = p2.astype(score_refs[0].dtype)

    # P@V (batched, contraction = S) ...
    o = jnp.einsum('hts,hds->htd', _mx(p2), _mx(vT),
                   preferred_element_type=jnp.float32)             # (H, Tq, dk)
    # ... then one lane-dense (Tq,D) slab -> single deep-contraction Wo matmul
    o_cat = jnp.concatenate([o[h] for h in range(num_head)], axis=-1)
    y = jnp.dot(_mx(o_cat), _mx(wo_ref[...]),
                preferred_element_type=jnp.float32)

    # fused bias + residual + LayerNorm (eval-mode dropout == identity)
    y = y + bo_ref[...] + resid_ref[0]
    mu = jnp.mean(y, axis=-1, keepdims=True)
    var = jnp.mean((y - mu) ** 2, axis=-1, keepdims=True)
    norm = (y - mu) * lax.rsqrt(var + 1e-5)
    out_ref[0] = (norm * lnw_ref[...] + lnb_ref[...]).astype(out_ref.dtype)


def _attn_vmem_bytes(tq, s, h, dk, d, need_scores):
    """Rough per-step VMEM footprint (blocks double-buffered + big temporaries)."""
    lane = 128
    f = 4
    q_block = h * tq * max(dk, lane)            # q lane dim dk padded to 128
    kv_block = 2 * h * max(dk, 8) * max(s, lane)
    resid = tq * max(d, lane)
    out_block = tq * max(d, lane)
    wo = d * max(d, lane)
    scores = (h * tq * max(s, lane)) if need_scores else 0
    temps = 6 * h * tq * max(s, lane)           # (H,Tq,S) softmax/decay temporaries
    return f * (2 * (q_block + kv_block + resid + out_block + scores) + wo + temps)


def _derive_tile_q(s, h, dk, d, need_scores, *, target=256, budget=40 * 2 ** 20):
    cands = [t for t in range(min(s, target), 0, -1)
             if s % t == 0 and (t % 8 == 0 or t == s)]
    if not cands:
        cands = [s]
    for t in cands:
        if _attn_vmem_bytes(t, s, h, dk, d, need_scores) <= budget:
            return t
    return cands[-1]


def attention_layer_pallas(qh, kT, vT, resid, gammas, wo, bo, ln_w, ln_b, *,
                           peek_cur, need_scores,
                           grid_g, q_gidx, kv_gidx, r_gidx):
    """Fused attention layer.

    qh    : (Gq, H, Sq, Dk)  head-split queries (Sq == S, or 1 for block4)
    kT/vT : (Gk, H, Dk, S)   head-split, transposed keys / values (lane axis = S)
    resid : (Gr, Sr, D)      residual (the layer's *query* input); Sr == S or 1
    grid_g: number of logical batch cells (B, or B*num_know for block4)
    *_gidx: grid-index -> array-index maps implementing the block4 de-duplication
    """
    _, num_head, sq, d_k = qh.shape
    _, _, _, seq_len = kT.shape
    dim_model = num_head * d_k
    _, sr, _ = resid.shape
    q_is_bcast = (sq == 1)

    tq = _derive_tile_q(seq_len, num_head, d_k, dim_model, need_scores)
    n_qt = seq_len // tq

    # reference: gamma = -1.0 * gamma.abs()  (tiny transform done outside)
    neg_gamma = (-jnp.abs(gammas)).reshape(num_head, 1, 1).astype(jnp.float32)

    if q_is_bcast:
        q_spec = pl.BlockSpec((1, num_head, 1, d_k),
                              lambda g, t: (q_gidx(g), 0, 0, 0))
    else:
        q_spec = pl.BlockSpec((1, num_head, tq, d_k),
                              lambda g, t: (q_gidx(g), 0, t, 0))
    if sr == 1:
        r_spec = pl.BlockSpec((1, 1, dim_model), lambda g, t: (r_gidx(g), 0, 0))
    else:
        r_spec = pl.BlockSpec((1, tq, dim_model), lambda g, t: (r_gidx(g), t, 0))

    kv_spec = pl.BlockSpec((1, num_head, d_k, seq_len),
                           lambda g, t: (kv_gidx(g), 0, 0, 0))

    in_specs = [
        pl.BlockSpec((num_head, 1, 1), lambda g, t: (0, 0, 0)),        # -|gamma|
        q_spec, kv_spec, kv_spec,
        pl.BlockSpec((dim_model, dim_model), lambda g, t: (0, 0)),     # Wo
        pl.BlockSpec((1, dim_model), lambda g, t: (0, 0)),             # bo
        r_spec,                                                        # residual
        pl.BlockSpec((1, dim_model), lambda g, t: (0, 0)),             # ln_w
        pl.BlockSpec((1, dim_model), lambda g, t: (0, 0)),             # ln_b
    ]

    out_spec_x = pl.BlockSpec((1, tq, dim_model), lambda g, t: (g, t, 0))
    out_shape_x = jax.ShapeDtypeStruct((grid_g, seq_len, dim_model), jnp.float32)

    kernel = functools.partial(
        _attn_layer_kernel,
        num_head=num_head, d_k=d_k, seq_len=seq_len, q_rows=tq,
        peek_cur=peek_cur, maxout=not peek_cur, need_scores=need_scores)

    vmem_est = _attn_vmem_bytes(tq, seq_len, num_head, d_k, dim_model, need_scores)
    cparams = pltpu.CompilerParams(
        # No cross-step carry (out/scores index both g and t) -> both axes can be
        # sharded across v7x's two TensorCores.
        dimension_semantics=("parallel", "parallel"),
        vmem_limit_bytes=int(min(max(vmem_est + (8 << 20), 32 << 20), 64 << 20)))

    args = (neg_gamma, qh, kT, vT, wo,
            bo.reshape(1, dim_model), resid,
            ln_w.reshape(1, dim_model), ln_b.reshape(1, dim_model))

    if need_scores:
        # TODO(synk): on v5e, a bf16 scores dtype halves the store/HBM traffic;
        # kept f32 here to match the reference output dtype.
        out_shapes = (out_shape_x,
                      jax.ShapeDtypeStruct(
                          (grid_g, num_head, seq_len, seq_len), jnp.float32))
        out_specs = (out_spec_x,
                     pl.BlockSpec((1, num_head, tq, seq_len),
                                  lambda g, t: (g, 0, t, 0)))
        x, scores = pl.pallas_call(
            kernel, out_shape=out_shapes, grid=(grid_g, n_qt),
            in_specs=in_specs, out_specs=out_specs,
            compiler_params=cparams,
        )(*args)
        return x, scores
    else:
        x = pl.pallas_call(
            kernel, out_shape=out_shape_x, grid=(grid_g, n_qt),
            in_specs=in_specs, out_specs=out_spec_x,
            compiler_params=cparams,
        )(*args)
        return x, None


# ---------------------------------------------------------------------------
# Transformer layers (eval-mode semantics)
# ---------------------------------------------------------------------------

def self_encoder_layer(layer_p, x, num_head, need_scores):
    """query = key = value = x; key_query_same=True; peek_cur=True."""
    b, s, d = x.shape
    d_k = d // num_head
    x_flat = x.reshape(b * s, d)
    # Fused [Wq | Wv] projection: one HBM read of x, one matmul; K reuses Q.
    w_qv = jnp.concatenate([layer_p["Wq"], layer_p["Wv"]], axis=1)
    b_qv = jnp.concatenate([layer_p["bq"], layer_p["bv"]], axis=0)
    qv = linear_pallas(x_flat, w_qv, b_qv)
    qh = _split_heads(qv[:, :d], b, s, num_head, d_k)      # (B,H,S,Dk)
    kT = _split_heads_t(qv[:, :d], b, s, num_head, d_k)    # (B,H,Dk,S)  k == q
    vT = _split_heads_t(qv[:, d:], b, s, num_head, d_k)
    ident = lambda g: g
    return attention_layer_pallas(
        qh, kT, vT, x, layer_p["gammas"], layer_p["Wo"], layer_p["bo"],
        layer_p["ln_w"], layer_p["ln_b"],
        peek_cur=True, need_scores=need_scores,
        grid_g=b, q_gidx=ident, kv_gidx=ident, r_gidx=ident)


def retriever_layer(layer_p, q_in, v_in, num_head, need_scores):
    """query = key = q_in, values = v_in; key_query_same=True; peek_cur=True."""
    b, s, d = q_in.shape
    d_k = d // num_head
    q = linear_pallas(q_in.reshape(b * s, d), layer_p["Wq"], layer_p["bq"])
    v = linear_pallas(v_in.reshape(b * s, d), layer_p["Wv"], layer_p["bv"])
    qh = _split_heads(q, b, s, num_head, d_k)
    kT = _split_heads_t(q, b, s, num_head, d_k)             # Wk is Wq, key == query
    vT = _split_heads_t(v, b, s, num_head, d_k)
    ident = lambda g: g
    return attention_layer_pallas(
        qh, kT, vT, q_in, layer_p["gammas"], layer_p["Wo"], layer_p["bo"],
        layer_p["ln_w"], layer_p["ln_b"],
        peek_cur=True, need_scores=need_scores,
        grid_g=b, q_gidx=ident, kv_gidx=ident, r_gidx=ident)


def block4_layer(layer_p, know_params, question_rep, knowledge_rep, num_head):
    """query = knowledge prototypes (broadcast over B,S), key = question_rep,
    values = knowledge_rep; key_query_same=False; peek_cur=False (max_out)."""
    nk, d = know_params.shape
    b, s, _ = question_rep.shape
    d_k = d // num_head
    # De-duplicated projections: the PyTorch reference projects the nk-times
    # broadcast tensors; identical result is obtained by projecting once.
    q_proto = linear_pallas(know_params, layer_p["Wq"], layer_p["bq"])   # (nk, D)
    k = linear_pallas(question_rep.reshape(b * s, d), layer_p["Wk"], layer_p["bk"])
    v = linear_pallas(knowledge_rep.reshape(b * s, d), layer_p["Wv"], layer_p["bv"])
    qh = q_proto.reshape(nk, num_head, 1, d_k)              # (nk, H, 1, Dk)
    kT = _split_heads_t(k, b, s, num_head, d_k)             # (B, H, Dk, S)
    vT = _split_heads_t(v, b, s, num_head, d_k)
    resid = know_params.reshape(nk, 1, d)                   # residual = K rows
    return attention_layer_pallas(
        qh, kT, vT, resid, layer_p["gammas"], layer_p["Wo"], layer_p["bo"],
        layer_p["ln_w"], layer_p["ln_b"],
        peek_cur=False, need_scores=True,
        grid_g=b * nk,
        q_gidx=lambda g: g % nk,      # prototype index
        kv_gidx=lambda g: g // nk,    # batch index (no nk-times duplication in HBM)
        r_gidx=lambda g: g % nk)


# ---------------------------------------------------------------------------
# DTransformer forward (eval)
# ---------------------------------------------------------------------------

def dtransformer_forward(params, concept_emb, interaction_emb, seqs_length):
    num_head = params["num_head"]
    nk = params["num_know"]
    del seqs_length  # only used by training-mode stochastic mask dropping

    question_rep, _ = self_encoder_layer(
        params["question_encoder"], concept_emb, num_head, need_scores=False)
    interaction_rep, _ = self_encoder_layer(
        params["knowledge_encoder"], interaction_emb, num_head, need_scores=False)
    knowledge_rep, q_scores = retriever_layer(
        params["knowledge_retriever"], question_rep, interaction_rep,
        num_head, need_scores=True)

    b, s, d = knowledge_rep.shape
    z, k_scores = block4_layer(
        params["block4"], params["knowledge_params"], question_rep,
        knowledge_rep, num_head)

    z = z.reshape(b, nk, s, d).transpose(0, 2, 1, 3).reshape(b, s, nk * d)
    k_scores = k_scores.reshape(b, nk, num_head, s, s).transpose(0, 2, 3, 1, 4)
    return z, q_scores, k_scores


# ---------------------------------------------------------------------------
# Deterministic parameter init (synthetic — no checkpoint)
# ---------------------------------------------------------------------------

def _init_linear(key, din, dout):
    k1, k2 = jax.random.split(key)
    bound = 1.0 / (din ** 0.5)
    W = jax.random.uniform(k1, (din, dout), jnp.float32, -bound, bound)
    b = jax.random.uniform(k2, (dout,), jnp.float32, -bound, bound)
    return W, b


def _init_layer(key, D, H, key_query_same):
    keys = jax.random.split(key, 5)
    Wq, bq = _init_linear(keys[0], D, D)
    if key_query_same:
        Wk, bk = Wq, bq
    else:
        Wk, bk = _init_linear(keys[1], D, D)
    Wv, bv = _init_linear(keys[2], D, D)
    Wo, bo = _init_linear(keys[3], D, D)
    gammas = jax.random.uniform(keys[4], (H,), jnp.float32, -1.0, 1.0)
    return dict(Wq=Wq, bq=bq, Wk=Wk, bk=bk, Wv=Wv, bv=bv, Wo=Wo, bo=bo,
                gammas=gammas,
                ln_w=jnp.ones((D,), jnp.float32),
                ln_b=jnp.zeros((D,), jnp.float32))


def init_params(key, dim_model, num_head, num_know):
    keys = jax.random.split(key, 5)
    return dict(
        num_head=num_head,
        num_know=num_know,
        question_encoder=_init_layer(keys[0], dim_model, num_head, True),
        knowledge_encoder=_init_layer(keys[1], dim_model, num_head, True),
        knowledge_retriever=_init_layer(keys[2], dim_model, num_head, True),
        block4=_init_layer(keys[3], dim_model, num_head, False),  # key_query_same=False
        knowledge_params=jax.random.uniform(
            keys[4], (num_know, dim_model), jnp.float32, -1.0, 1.0),
    )


# ---------------------------------------------------------------------------

if __name__ == "__main__":
    B, S, D = 2, 8, 32
    num_head, num_know = 4, 4

    root = jax.random.PRNGKey(0)
    kp, kc, ki = jax.random.split(root, 3)
    params = init_params(kp, D, num_head, num_know)

    concept_emb = jax.random.normal(kc, (B, S, D), jnp.float32)
    interaction_emb = jax.random.normal(ki, (B, S, D), jnp.float32)
    seqs_length = jnp.full((B,), S, dtype=jnp.int32)

    z, q_scores, k_scores = dtransformer_forward(
        params, concept_emb, interaction_emb, seqs_length)
    jax.block_until_ready((z, q_scores, k_scores))

    assert z.shape == (B, S, num_know * D)
    assert q_scores.shape == (B, num_head, S, S)
    assert k_scores.shape == (B, num_head, S, num_know, S)
    assert bool(jnp.all(jnp.isfinite(z)))
    assert bool(jnp.all(jnp.isfinite(q_scores)))
    assert bool(jnp.all(jnp.isfinite(k_scores)))

    print("KERNEL_OK")
</pallas_src>

<mosaic_0001>
module attributes {stable_mosaic.version = 11 : i64} {
  func.func @_linear_kernel(%arg0: i32, %arg1: memref<16x32xf32, #tpu.memory_space<vmem>>, %arg2: memref<32x64xf32, #tpu.memory_space<vmem>>, %arg3: memref<1x64xf32, #tpu.memory_space<vmem>>, %arg4: memref<16x64xf32, #tpu.memory_space<vmem>>) attributes {dimension_semantics = [#tpu.dimension_semantics<parallel>], iteration_bounds = array<i64: 1>, scalar_prefetch = 0 : i64, scratch_operands = 0 : i64, tpu.core_type = #tpu.core_type<tc>, window_params = [{transform_indices = @transform_0, window_bounds = array<i64: 16, 32>}, {pipeline_mode = #tpu.pipeline_mode<synchronous>, transform_indices = @transform_1, window_bounds = array<i64: 32, 64>}, {pipeline_mode = #tpu.pipeline_mode<synchronous>, transform_indices = @transform_2, window_bounds = array<i64: 1, 64>}, {transform_indices = @transform_3, window_bounds = array<i64: 16, 64>}]} {
    %c0 = arith.constant 0 : index
    %c0_0 = arith.constant 0 : index
    %0 = vector.load %arg1[%c0, %c0_0] : memref<16x32xf32, #tpu.memory_space<vmem>>, vector<16x32xf32>
    %c0_1 = arith.constant 0 : index
    %c0_2 = arith.constant 0 : index
    %1 = vector.load %arg2[%c0_1, %c0_2] : memref<32x64xf32, #tpu.memory_space<vmem>>, vector<32x64xf32>
    %cst = arith.constant dense<0.000000e+00> : vector<16x64xf32>
    %2 = tpu.matmul %0, %1, %cst {dimension_numbers = #tpu.dot_dimension_numbers<[1], [0], [0], [1], [0, 0, 1, 1], [], []>} : vector<16x32xf32>, vector<32x64xf32>, vector<16x64xf32> -> vector<16x64xf32>
    %c0_3 = arith.constant 0 : index
    %c0_4 = arith.constant 0 : index
    %3 = vector.load %arg3[%c0_3, %c0_4] : memref<1x64xf32, #tpu.memory_space<vmem>>, vector<1x64xf32>
    %4 = vector.broadcast %3 : vector<1x64xf32> to vector<16x64xf32>
    %5 = arith.addf %2, %4 : vector<16x64xf32>
    %c0_5 = arith.constant 0 : index
    %c0_6 = arith.constant 0 : index
    %6 = vector.load %arg4[%c0_5, %c0_6] : memref<16x64xf32, #tpu.memory_space<vmem>>, vector<16x64xf32>
    tpu.vector_store %arg4[%c0_5, %c0_6], %5 {strides = array<i32>} : memref<16x64xf32, #tpu.memory_space<vmem>>, vector<16x64xf32>,
    return
  }
  func.func @transform_0(%arg0: i32) -> (i32, i32) {
    %c0_i32 = arith.constant 0 : i32
    %c0_i32_0 = arith.constant 0 : i32
    return %arg0, %c0_i32 : i32, i32
  }
  func.func @transform_1(%arg0: i32) -> (i32, i32) {
    %c0_i32 = arith.constant 0 : i32
    %c0_i32_0 = arith.constant 0 : i32
    %c0_i32_1 = arith.constant 0 : i32
    return %c0_i32, %c0_i32_0 : i32, i32
  }
  func.func @transform_2(%arg0: i32) -> (i32, i32) {
    %c0_i32 = arith.constant 0 : i32
    %c0_i32_0 = arith.constant 0 : i32
    %c0_i32_1 = arith.constant 0 : i32
    return %c0_i32, %c0_i32_0 : i32, i32
  }
  func.func @transform_3(%arg0: i32) -> (i32, i32) {
    %c0_i32 = arith.constant 0 : i32
    %c0_i32_0 = arith.constant 0 : i32
    return %arg0, %c0_i32 : i32, i32
  }
}

</mosaic_0001>

<bundles_post_ra>
// kernel: tpu_custom_call.1
= control target key start
LH: loop header
LB: loop body
LE: loop exit
PB: predicated region body
PF: predicated region fallthrough
CT: control target
= control target key end

     0   :  { %8 = vsyncpa [#allocation3], 0  ;;  %s337_s0 = inlined_call_operand.hbm [shape: f32[16,32], index: 0, kind: input, shape index: {}]   ;;  %s338_s1 = inlined_call_operand.hbm [shape: f32[32,64], index: 1, kind: input, shape index: {}]   ;;  %s339_s2 = inlined_call_operand.vmem [shape: f32[1,64], index: 2, kind: input, shape index: {}]   ;;  %s340_s3 = inlined_call_operand.hbm [shape: f32[16,64], index: 3, kind: output, shape index: {}]  }
   0x1   :  { %9 = vsyncpa [#allocation6], 0 }
   0x2   :  { %10 = vsyncpa [#allocation4], 0  ;;  %s264_s12 = smov [#allocation2]   ;;  %s192_s16 = scalar_lea.hbm %s337_s0, 256 }
   0x3   :  { %s16_s13 = sshll.u32 %s264_s12, 4  ;;  %p193_p0 = scmp.ne.s32.totalorder %s337_s0, %s192_s16  ;;  %s17_s13 = int_to_ptr.vmem [resolvable:$true] %s16_s13 }
   0x4   :  { %p196_p1 = scmp.lt.u32.totalorder %s192_s16, %s337_s0 }
   0x6   :  { %p198_p2 = pnand %p196_p1, %p193_p0 }
   0x8   :  { %201 = shalt.err (!%p198_p2)
}
   0x9   :  { %s202_s21 = scalar_lea.vmem %s17_s13, 256  ;;  %p207_p4 = scmp.lt.s32.totalorder %s17_s13, %s17_s13 }
   0xa   :  { %p203_p3 = scmp.ne.s32.totalorder %s17_s13, %s202_s21  ;;  %p208_p5 = scmp.lt.s32.totalorder %s202_s21, %s202_s21 }
   0xc   :  { %p209_p6 = por %p208_p5, %p207_p4 }
   0xe   :  { %p210_p7 = pnand %p209_p6, %p203_p3 }
  0x10   :  { %213 = shalt.err (!%p210_p7)
}
  0x11   :  { %s265_s22 = smov 128   ;;  %s266_s23 = smov 8  }
  0x12   :  { %22 = dma.hbm_to_vmem [thread:$0]  %s337_s0, 256, %s17_s13, [#allocation3], %s265_s22, %s265_s22, %s266_s23  }
  0x13   :  { %s267_s26 = smov [#allocation5]   ;;  %s214_s30 = scalar_lea.hbm %s338_s1, 512 }
  0x14   :  { %s28_s27 = sshll.u32 %s267_s26, 4  ;;  %p215_p8 = scmp.ne.s32.totalorder %s338_s1, %s214_s30  ;;  %s29_s27 = int_to_ptr.vmem [resolvable:$true] %s28_s27 }
  0x15   :  { %p218_p9 = scmp.lt.u32.totalorder %s214_s30, %s338_s1 }
  0x17   :  { %p220_p10 = pnand %p218_p9, %p215_p8 }
  0x19   :  { %223 = shalt.err (!%p220_p10)
}
  0x1a   :  { %s224_s8 = scalar_lea.vmem %s29_s27, 512  ;;  %p229_p12 = scmp.lt.s32.totalorder %s29_s27, %s29_s27 }
  0x1b   :  { %p225_p11 = scmp.ne.s32.totalorder %s29_s27, %s224_s8  ;;  %p230_p13 = scmp.lt.s32.totalorder %s224_s8, %s224_s8 }
  0x1d   :  { %p231_p0 = por %p230_p13, %p229_p12 }
  0x1f   :  { %p232_p1 = pnand %p231_p0, %p225_p11 }
  0x21   :  { %235 = shalt.err (!%p232_p1)
}
  0x22   :  { %34 = dma.hbm_to_vmem [thread:$0]  %s338_s1, 512, %s29_s27, [#allocation6], %s265_s22, %s265_s22, %s266_s23  }
  0x23   :  { %258 = dma.done.wait [#allocation3], 256  }
  0x24   :  { %259 = vsyncadd [#allocation3], 4294967040 }
  0x25   :  { %260 = dma.done.wait [#allocation6], 512  }
  0x26   :  { %261 = vsyncadd [#allocation6], 4294966784  ;;  %vm56_vm0 = vcmask 261120   ;;  %v45_v0 = vld [vmem:[#allocation5] sm:$0xff]  ;;  %v46_v1 = vld [vmem:[#allocation5 + $0x8] sm:$0xff]  ;;  %s268_s11 = smov [#allocation7]  }
  0x27   :  { %v47_v2 = vld [vmem:[#allocation5 + $0x10] sm:$0xff]  ;;  %v179_v3 = vpack.c.bf16 %v46_v1, %v45_v0  ;;  %v48_v4 = vld [vmem:[#allocation5 + $0x18] sm:$0xff]  ;;  %s146_s12 = sshll.u32 %s268_s11, 4  ;;  %vm138_vm1 = vcmask 523264   ;;  %s147_s12 = int_to_ptr.vmem [resolvable:$true] %s146_s12 }
  0x28   :  { %v43_v5 = vld [vmem:[#allocation2] sm:$0xff]  ;;  %v183_v6 = vpack.c.bf16 %v48_v4, %v47_v2  ;;  %v44_v7 = vld [vmem:[#allocation2 + $0x8] sm:$0xff]  ;;  %s236_s13 = scalar_lea.vmem %s147_s12, 256  ;;  %p241_p3 = scmp.lt.s32.totalorder %s147_s12, %s147_s12 }
  0x29   :  { %176 = vmatprep.mubr.msk.f32.mxu0 %vm56_vm0, %v43_v5  ;;  %180 = vmatprep.subr.bf16.mxu0 %v179_v3  ;;  %v159_v8 = vld [vmem:[%s339_s2] ss:$0 sm:$0xff]  ;;  %p237_p2 = scmp.ne.s32.totalorder %s147_s12, %s236_s13  ;;  %p242_p4 = scmp.lt.s32.totalorder %s236_s13, %s236_s13 }
  0x2a   :  { %182 = vmatpush3.bf16.msra.mxu0 %v179_v3 }
  0x2b   :  { %184 = vmatprep.subr.bf16.mxu0 %v183_v6  ;;  %p243_p5 = por %p242_p4, %p241_p3 }
  0x2d   :  { %p244_p6 = pnand %p243_p5, %p237_p2 }
  0x2e   :  { %186 = vmatpush3.bf16.msra.mxu0 %v183_v6 }
  0x31   :  { %177 = vmatmul.mubr.msk.f32.vlgmr.msra.gmra.mrb[0].mxu0 %vm56_vm0, %v44_v7 }
 0x104   :  { %v178_v9 = vpop.f32.mrb[0].mxu0 }
 0x105   :  { %v135_v10 = vadd.f32 %v178_v9, %v159_v8  ;;  %v129_v11 = vpop.f32.mrb[1].mxu0 }
 0x106   :  { %v130_v12 = vadd.f32 %v159_v8, %v129_v11 }
 0x107   :  { %140 = vst.msk [vmem:[#allocation7 + $0x8] sm:$0xff] %vm138_vm1, %v135_v10 }
 0x108   :  { %139 = vst.msk [vmem:[#allocation7] sm:$0xff] %vm138_vm1, %v130_v12 }
 0x109   :  { %247 = shalt.err (!%p244_p6)
}
 0x10a   :  { %s248_s2 = scalar_lea.hbm %s340_s3, 256 }
 0x10b   :  { %p249_p7 = scmp.ne.s32.totalorder %s340_s3, %s248_s2  ;;  %p252_p8 = scmp.lt.u32.totalorder %s248_s2, %s340_s3 }
 0x10d   :  { %p254_p9 = pnand %p252_p8, %p249_p7 }
 0x10f   :  { %257 = shalt.err (!%p254_p9)
}
 0x110   :  { %152 = dma.vmem_to_hbm [thread:$0]  %s147_s12, 256, %s340_s3, [#allocation4], %s265_s22, %s265_s22, %s266_s23  }
 0x111   :  { %262 = dma.done.wait [#allocation4], 256  }
 0x112   :  { %263 = vsyncadd [#allocation4], 4294967040 }
 0x113   :  { %156 = vsyncpa [#allocation3], 1 }
 0x114   :  { %157 = vsyncpa [#allocation6], 1 }
 0x115   :  { %158 = vsyncpa [#allocation4], 1 }

</bundles_post_ra>
